<compile_context>
chip_gen: v6e
topology: v6e:2x2x1
jax: 0.10.0
libtpu: 0.0.40
codegen_flags: <defaults>
</compile_context>

<pallas_src>
import functools

import jax
import jax.numpy as jnp
import numpy as np
from jax.experimental import pallas as pl
from jax.experimental.pallas import tpu as pltpu

_CE_IGNORED = -1.0   # real pixels have ce >= 0
_P_IGNORED = 2.0     # real target-class probs are <= 1.0


# --------------------------- Kernel 1: softmax CE ---------------------------

def _softmax_ce_kernel(preds_ref, label_ref, ptrue_ref, ce_ref, *, ignore_index):
    x = preds_ref[...].astype(jnp.float32)            # (C, R, 128), cast in-kernel
    lbl = label_ref[...]                               # (R, 128) int32
    m = jnp.max(x, axis=0)                             # (R, 128) - VPU max over C slices
    e = jnp.exp(x - m[None])                           # (C, R, 128)  EUP
    s = jnp.sum(e, axis=0)                             # (R, 128)
    ch = jax.lax.broadcasted_iota(jnp.int32, x.shape, 0)
    sel = ch == lbl[None]                              # target-class mask
    # where+sum instead of one-hot multiply: one fewer (C,R,128) temp / VPU sweep.
    x_true = jnp.sum(jnp.where(sel, x, 0.0), axis=0)   # logit at target class
    e_true = jnp.sum(jnp.where(sel, e, 0.0), axis=0)   # exp at target class (reuse e)
    ce = (m + jnp.log(s)) - x_true                     # -log_softmax at target
    p_true = e_true / s                                # softmax prob at target (no extra exp)
    valid = lbl != ignore_index
    ce_ref[...] = jnp.where(valid, ce, _CE_IGNORED)
    ptrue_ref[...] = jnp.where(valid, p_true, _P_IGNORED)


# ------------------- Kernel 2: OHEM masked sum / count ----------------------

def _masked_sum_kernel(scal_ref, ce_ref, pt_ref, sum_ref, cnt_ref, *, total_blocks):
    core = pl.program_id(0)
    step = pl.program_id(1)

    @pl.when(step == 0)
    def _():
        sum_ref[...] = jnp.zeros_like(sum_ref)
        cnt_ref[...] = jnp.zeros_like(cnt_ref)

    gblk = core * pl.num_programs(1) + step

    @pl.when(gblk < total_blocks)                      # skip clamped duplicate block
    def _():
        thr = scal_ref[0]                              # OHEM prob threshold (SMEM)
        apply_thr = scal_ref[1]                        # 1.0 -> gate on prob < thr
        ce = ce_ref[...]                               # (rows_block, 128)
        pt = pt_ref[...]
        valid = ce >= 0.0                              # sentinel -1 marks ignored/padded
        kept = jnp.logical_and(valid, jnp.logical_or(pt < thr, apply_thr < 0.5))
        kept_f = kept.astype(jnp.float32)
        sum_ref[...] += ce * kept_f                    # dense VPU accumulation
        cnt_ref[...] += kept_f


# ------------------------------ Tiling helpers -------------------------------

def _tpu_config():
    kind = ""
    try:
        kind = jax.devices()[0].device_kind.lower()
    except Exception:
        pass
    if "v7" in kind:   # 64 MiB VMEM / TensorCore, 2 TCs: cap footprint, split kernel-2
        return dict(max_px=16384, vmem_budget=36 << 20, vmem_limit=48 << 20, num_cores=2)
    if "v6" in kind:   # 128 MiB VMEM, ~1.4 TB/s HBM: big tiles amortize per-step overhead
        return dict(max_px=32768, vmem_budget=48 << 20, vmem_limit=64 << 20, num_cores=1)
    if "v5" in kind:   # 128 MiB physical but small default scoped limit: raise it explicitly
        return dict(max_px=16384, vmem_budget=32 << 20, vmem_limit=48 << 20, num_cores=1)
    return dict(max_px=16384, vmem_budget=24 << 20, vmem_limit=None, num_cores=1)


def _pick_tile_px(hw, c, itemsize, *, max_px, vmem_budget):
    """Largest pixel tile (multiple of 1024 = 8*128) fitting the VMEM budget.

    Budget accounts for double-buffered DMA tiles AND ~3x C*tile*4B of live f32
    temporaries inside the kernel (x, e, masked-select).  For very large C the
    channel axis could additionally be chunked with an online softmax; not
    needed for typical segmentation class counts.
    """
    per_px = c * (2 * itemsize + 12) + 2 * 4 + 2 * 2 * 4
    cap = max(1024, min(max_px, (vmem_budget // per_px) // 1024 * 1024))
    if hw % 1024 == 0:
        t = min(cap, hw)
        while hw % t != 0:
            t -= 1024
        return t, hw
    # Pixel count not a multiple of 1024: pad the pixel axis (one XLA copy of preds).
    t = min(cap, ((hw + 1023) // 1024) * 1024)
    hw_pad = ((hw + t - 1) // t) * t
    return t, hw_pad


def _pick_rows_block(total_rows, cap=2048):
    """Kernel-2 block rows (decoupled from kernel-1 tiling): ~0.5-1 MiB blocks."""
    cap = min(cap, total_rows)
    cap -= cap % 8
    cap = max(cap, 8)
    r = cap
    while r >= 8:
        if total_rows % r == 0:
            break
        r -= 8
    if r == total_rows or r >= 256:
        return r, total_rows
    # No decent divisor: pad the row axis instead (cheap f32 copy, sentinel rows).
    padded = ((total_rows + cap - 1) // cap) * cap
    return cap, padded


# --------------------------------- Wrapper -----------------------------------

def ohem_cross_entropy_loss(preds, targets, *, ignore_index, threshold=0.7,
                            min_kept=0.1):
    n, c, h, w = preds.shape
    hw = h * w
    cfg = _tpu_config()
    itemsize = jnp.dtype(preds.dtype).itemsize
    tile_px, hw_pad = _pick_tile_px(hw, c, itemsize,
                                    max_px=cfg["max_px"],
                                    vmem_budget=cfg["vmem_budget"])
    rows_pad = hw_pad // 128
    tile_rows = tile_px // 128                          # multiple of 8

    preds3 = preds.reshape(n, c, hw)                    # free, keeps original dtype
    labels2 = targets.reshape(n, hw).astype(jnp.int32)
    if hw_pad != hw:
        preds3 = jnp.pad(preds3, ((0, 0), (0, 0), (0, hw_pad - hw)))
        labels2 = jnp.pad(labels2, ((0, 0), (0, hw_pad - hw)),
                          constant_values=ignore_index)  # padded pixels -> ignored
    preds4 = preds3.reshape(n, c, rows_pad, 128)         # free reshapes
    labels3 = labels2.reshape(n, rows_pad, 128)

    kernel1 = functools.partial(_softmax_ce_kernel, ignore_index=ignore_index)
    p_true, ce = pl.pallas_call(
        kernel1,
        out_shape=(
            jax.ShapeDtypeStruct((n, rows_pad, 128), jnp.float32),
            jax.ShapeDtypeStruct((n, rows_pad, 128), jnp.float32),
        ),
        grid_spec=pltpu.PrefetchScalarGridSpec(
            num_scalar_prefetch=0,
            grid=(n, rows_pad // tile_rows),
            in_specs=[
                pl.BlockSpec((None, c, tile_rows, 128), lambda i, t: (i, 0, t, 0)),
                pl.BlockSpec((None, tile_rows, 128), lambda i, t: (i, t, 0)),
            ],
            out_specs=[
                pl.BlockSpec((None, tile_rows, 128), lambda i, t: (i, t, 0)),
                pl.BlockSpec((None, tile_rows, 128), lambda i, t: (i, t, 0)),
            ],
        ),
        compiler_params=pltpu.CompilerParams(
            dimension_semantics=("parallel", "parallel"),
            vmem_limit_bytes=cfg["vmem_limit"]),
    )(preds4, labels3)

    # ---------------- OHEM threshold selection (plain JAX glue) ----------------
    p_flat = p_true.reshape(-1)                         # padded pixel order
    p_total_pad = p_flat.shape[0]
    valid_flat = p_flat < 1.5                           # sentinel 2.0 marks ignored/padded
    num_valid = jnp.sum(valid_flat.astype(jnp.int32))

    # min_kept = int(ratio * num_valid)  (truncation, matching Python int())
    min_kept_n = (jnp.float32(min_kept) * num_valid.astype(jnp.float32)).astype(jnp.int32)
    apply_thr = (min_kept_n < num_valid) & (num_valid > 0) & (min_kept_n > 0)
    k = jnp.maximum(min_kept_n, 1)                      # 1-based rank of the kth element

    # Exact kth-smallest valid prob via MSB-first radix select on the f32 bit
    # pattern (monotone for non-negative floats): 8 rounds of 16-way counting,
    # each one fused compare+reduce pass.  Replaces the previous giant
    # jax.lax.top_k(k ~ 0.1 * P) which would dwarf both Pallas kernels.
    u = jax.lax.bitcast_convert_type(p_flat, jnp.uint32)   # invalid -> bits(2.0) > bits(1.0)
    prefix = jnp.uint32(0)
    for shift in (28, 24, 20, 16, 12, 8, 4, 0):
        cand = prefix + (((jnp.arange(16, dtype=jnp.uint32) + 1) << shift) - 1)
        counts = jnp.sum((u[:, None] <= cand[None, :]).astype(jnp.int32), axis=0)
        d = jnp.argmax(counts >= k).astype(jnp.uint32)
        prefix = prefix + (d << shift)
    v_bits = prefix                                      # exact bits of kth smallest valid prob

    # Full-array (unpadded) index of that element (ties -> smallest index).
    pos = jnp.arange(p_total_pad, dtype=jnp.int32)
    unp_idx = (pos // hw_pad) * hw + (pos % hw_pad)      # unpadded flat index (pads are invalid)
    is_kth = valid_flat & (u == v_bits)
    kth_full_idx = jnp.min(jnp.where(is_kth, unp_idx, jnp.int32(2**31 - 1)))

    # Reference quirk (kept intentionally): the kth element's *compressed*
    # (valid-only) index is used to index the *full* prob array.  One masked
    # count instead of materializing a P-length cumsum.
    threshold_index = jnp.sum((valid_flat & (unp_idx < kth_full_idx)).astype(jnp.int32))
    threshold_index = jnp.minimum(threshold_index, jnp.int32(n * hw - 1))
    prob_at_ti = p_flat[(threshold_index // hw) * hw_pad + (threshold_index % hw)]

    thr0 = jnp.float32(threshold)
    thr = jnp.where(apply_thr & (prob_at_ti > thr0), prob_at_ti, thr0)
    # TODO(synk): the PyTorch module mutates self.threshold across calls
    # (stateful); this kernel computes the per-call threshold only.

    scalars = jnp.stack([thr, apply_thr.astype(jnp.float32)]).astype(jnp.float32)

    # -------- Kernel 2: masked sum / count over large (rows, 128) blocks -------
    rows_total = n * rows_pad
    ce_rows = ce.reshape(rows_total, 128)               # free reshapes
    pt_rows = p_true.reshape(rows_total, 128)
    rows_block, rows_padded = _pick_rows_block(rows_total, cap=2048)
    if rows_padded != rows_total:
        ce_rows = jnp.pad(ce_rows, ((0, rows_padded - rows_total), (0, 0)),
                          constant_values=_CE_IGNORED)
        pt_rows = jnp.pad(pt_rows, ((0, rows_padded - rows_total), (0, 0)),
                          constant_values=_P_IGNORED)
    total_blocks = rows_padded // rows_block
    num_cores = cfg["num_cores"]
    steps_per_core = (total_blocks + num_cores - 1) // num_cores

    def data_map(core, step):
        return (jnp.minimum(core * steps_per_core + step, total_blocks - 1), 0)

    kernel2 = functools.partial(_masked_sum_kernel, total_blocks=total_blocks)
    sums, cnts = pl.pallas_call(
        kernel2,
        out_shape=(
            jax.ShapeDtypeStruct((num_cores, rows_block, 128), jnp.float32),
            jax.ShapeDtypeStruct((num_cores, rows_block, 128), jnp.float32),
        ),
        grid_spec=pltpu.PrefetchScalarGridSpec(
            num_scalar_prefetch=0,
            grid=(num_cores, steps_per_core),
            in_specs=[
                pl.BlockSpec(memory_space=pltpu.MemorySpace.SMEM),
                pl.BlockSpec((rows_block, 128), data_map),
                pl.BlockSpec((rows_block, 128), data_map),
            ],
            out_specs=[
                pl.BlockSpec((None, rows_block, 128), lambda core, step: (core, 0, 0)),
                pl.BlockSpec((None, rows_block, 128), lambda core, step: (core, 0, 0)),
            ],
        ),
        compiler_params=pltpu.CompilerParams(
            dimension_semantics=("parallel", "arbitrary")),
    )(scalars, ce_rows, pt_rows)

    sum_loss = jnp.sum(sums)
    cnt = jnp.sum(cnts)
    # Matches the reference: mean over an empty kept-set yields NaN.
    return sum_loss / cnt


# ------------------------------ Pure-JAX reference ---------------------------

def ohem_reference(preds, targets, *, ignore_index, threshold=0.7, min_kept=0.1):
    """Pure-JAX re-implementation of the PyTorch forward (for verification)."""
    n, c, h, w = preds.shape
    label = targets.reshape(-1).astype(jnp.int32)
    valid = label != ignore_index
    num_valid = jnp.sum(valid.astype(jnp.int32))
    prob_cp = jnp.transpose(jax.nn.softmax(preds.astype(jnp.float32), axis=1),
                            (1, 0, 2, 3)).reshape(c, -1)
    onehot = jax.nn.one_hot(label, c, dtype=jnp.float32).T
    prob = jnp.sum(prob_cp * onehot, axis=0)
    min_kept_n = (jnp.float32(min_kept) * num_valid.astype(jnp.float32)).astype(jnp.int32)
    apply_thr = (min_kept_n < num_valid) & (num_valid > 0) & (min_kept_n > 0)
    keys = jnp.where(valid, prob, jnp.inf)
    order = jnp.argsort(keys)
    kth_full_idx = order[jnp.maximum(min_kept_n - 1, 0)]
    comp_idx = jnp.cumsum(valid.astype(jnp.int32)) - 1
    prob_at_ti = prob[comp_idx[kth_full_idx]]
    thr0 = jnp.float32(threshold)
    thr = jnp.where(apply_thr & (prob_at_ti > thr0), prob_at_ti, thr0)
    kept = jnp.where(apply_thr, valid & (prob < thr), valid)
    logp = jnp.transpose(jax.nn.log_softmax(preds.astype(jnp.float32), axis=1),
                         (1, 0, 2, 3)).reshape(c, -1)
    ce = -jnp.sum(logp * onehot, axis=0)
    kept_f = kept.astype(jnp.float32)
    return jnp.sum(ce * kept_f) / jnp.sum(kept_f)


if __name__ == "__main__":
    key = jax.random.PRNGKey(0)
    kp, kt = jax.random.split(key)
    n, c, h, w = 2, 4, 16, 16
    ignore_index = 3  # within [0, c) so torch.nn.functional.one_hot is well-defined
    preds = jax.random.normal(kp, (n, c, h, w), dtype=jnp.float32) * 2.0
    targets = jax.random.randint(kt, (n, h, w), 0, c, dtype=jnp.int32)

    loss_fn = jax.jit(functools.partial(ohem_cross_entropy_loss,
                                        ignore_index=ignore_index,
                                        threshold=0.7, min_kept=0.1))
    loss = jax.block_until_ready(loss_fn(preds, targets))

    ref = ohem_reference(preds, targets, ignore_index=ignore_index,
                         threshold=0.7, min_kept=0.1)
    np.testing.assert_allclose(np.asarray(loss), np.asarray(ref), rtol=1e-4, atol=1e-5)
    print("KERNEL_OK")
</pallas_src>

<mosaic_0001>
module attributes {stable_mosaic.version = 11 : i64} {
  func.func @_softmax_ce_kernel(%arg0: i32, %arg1: i32, %arg2: memref<1x4x8x128xf32, #tpu.memory_space<vmem>>, %arg3: memref<1x8x128xi32, #tpu.memory_space<vmem>>, %arg4: memref<1x8x128xf32, #tpu.memory_space<vmem>>, %arg5: memref<1x8x128xf32, #tpu.memory_space<vmem>>) attributes {dimension_semantics = [#tpu.dimension_semantics<parallel>, #tpu.dimension_semantics<parallel>], iteration_bounds = array<i64: 2, 1>, scalar_prefetch = 0 : i64, scratch_operands = 0 : i64, tpu.core_type = #tpu.core_type<tc>, window_params = [{transform_indices = @transform_0, window_bounds = array<i64: 1, 4, 8, 128>}, {transform_indices = @transform_1, window_bounds = array<i64: 1, 8, 128>}, {transform_indices = @transform_2, window_bounds = array<i64: 1, 8, 128>}, {transform_indices = @transform_3, window_bounds = array<i64: 1, 8, 128>}]} {
    %c0 = arith.constant 0 : index
    %c0_0 = arith.constant 0 : index
    %c0_1 = arith.constant 0 : index
    %c0_2 = arith.constant 0 : index
    %0 = vector.load %arg2[%c0, %c0_0, %c0_1, %c0_2] : memref<1x4x8x128xf32, #tpu.memory_space<vmem>>, vector<1x4x8x128xf32>
    %1 = vector.shape_cast %0 : vector<1x4x8x128xf32> to vector<4x8x128xf32>
    %c0_3 = arith.constant 0 : index
    %c0_4 = arith.constant 0 : index
    %c0_5 = arith.constant 0 : index
    %2 = vector.load %arg3[%c0_3, %c0_4, %c0_5] : memref<1x8x128xi32, #tpu.memory_space<vmem>>, vector<1x8x128xi32>
    %3 = vector.shape_cast %2 : vector<1x8x128xi32> to vector<8x128xi32>
    %cst = arith.constant dense<0xFF800000> : vector<8x128xf32>
    %4 = vector.multi_reduction <maximumf>, %1, %cst [0] : vector<4x8x128xf32> to vector<8x128xf32>
    %5 = vector.shape_cast %4 : vector<8x128xf32> to vector<1x8x128xf32>
    %6 = vector.broadcast %5 : vector<1x8x128xf32> to vector<4x8x128xf32>
    %7 = arith.subf %1, %6 : vector<4x8x128xf32>
    %8 = math.exp %7 : vector<4x8x128xf32>
    %cst_6 = arith.constant dense<0.000000e+00> : vector<8x128xf32>
    %9 = vector.multi_reduction <add>, %8, %cst_6 [0] : vector<4x8x128xf32> to vector<8x128xf32>
    %10 = tpu.iota {dimensions = array<i32: 0>} : vector<4x8x128xi32>
    %11 = vector.shape_cast %3 : vector<8x128xi32> to vector<1x8x128xi32>
    %12 = vector.broadcast %11 : vector<1x8x128xi32> to vector<4x8x128xi32>
    %13 = arith.cmpi eq, %10, %12 : vector<4x8x128xi32>
    %cst_7 = arith.constant 0.000000e+00 : f32
    %14 = vector.broadcast %cst_7 : f32 to vector<4x8x128xf32>
    %15 = arith.select %13, %1, %14 : vector<4x8x128xi1>, vector<4x8x128xf32>
    %cst_8 = arith.constant dense<0.000000e+00> : vector<8x128xf32>
    %16 = vector.multi_reduction <add>, %15, %cst_8 [0] : vector<4x8x128xf32> to vector<8x128xf32>
    %cst_9 = arith.constant 0.000000e+00 : f32
    %17 = vector.broadcast %cst_9 : f32 to vector<4x8x128xf32>
    %18 = arith.select %13, %8, %17 : vector<4x8x128xi1>, vector<4x8x128xf32>
    %cst_10 = arith.constant dense<0.000000e+00> : vector<8x128xf32>
    %19 = vector.multi_reduction <add>, %18, %cst_10 [0] : vector<4x8x128xf32> to vector<8x128xf32>
    %20 = math.log %9 : vector<8x128xf32>
    %21 = arith.addf %4, %20 : vector<8x128xf32>
    %22 = arith.subf %21, %16 : vector<8x128xf32>
    %23 = arith.divf %19, %9 : vector<8x128xf32>
    %c3_i32 = arith.constant 3 : i32
    %24 = vector.broadcast %c3_i32 : i32 to vector<8x128xi32>
    %25 = arith.cmpi ne, %3, %24 : vector<8x128xi32>
    %cst_11 = arith.constant -1.000000e+00 : f32
    %26 = vector.broadcast %cst_11 : f32 to vector<8x128xf32>
    %27 = arith.select %25, %22, %26 : vector<8x128xi1>, vector<8x128xf32>
    %c0_12 = arith.constant 0 : index
    %c0_13 = arith.constant 0 : index
    %c0_14 = arith.constant 0 : index
    %28 = vector.load %arg5[%c0_12, %c0_13, %c0_14] : memref<1x8x128xf32, #tpu.memory_space<vmem>>, vector<1x8x128xf32>
    %29 = vector.shape_cast %28 : vector<1x8x128xf32> to vector<8x128xf32>
    %30 = vector.shape_cast %27 : vector<8x128xf32> to vector<1x8x128xf32>
    tpu.vector_store %arg5[%c0_12, %c0_13, %c0_14], %30 {strides = array<i32>} : memref<1x8x128xf32, #tpu.memory_space<vmem>>, vector<1x8x128xf32>,
    %cst_15 = arith.constant 2.000000e+00 : f32
    %31 = vector.broadcast %cst_15 : f32 to vector<8x128xf32>
    %32 = arith.select %25, %23, %31 : vector<8x128xi1>, vector<8x128xf32>
    %c0_16 = arith.constant 0 : index
    %c0_17 = arith.constant 0 : index
    %c0_18 = arith.constant 0 : index
    %33 = vector.load %arg4[%c0_16, %c0_17, %c0_18] : memref<1x8x128xf32, #tpu.memory_space<vmem>>, vector<1x8x128xf32>
    %34 = vector.shape_cast %33 : vector<1x8x128xf32> to vector<8x128xf32>
    %35 = vector.shape_cast %32 : vector<8x128xf32> to vector<1x8x128xf32>
    tpu.vector_store %arg4[%c0_16, %c0_17, %c0_18], %35 {strides = array<i32>} : memref<1x8x128xf32, #tpu.memory_space<vmem>>, vector<1x8x128xf32>,
    return
  }
  func.func @transform_0(%arg0: i32, %arg1: i32) -> (i32, i32, i32, i32) {
    %c0_i32 = arith.constant 0 : i32
    %c0_i32_0 = arith.constant 0 : i32
    %c0_i32_1 = arith.constant 0 : i32
    return %arg0, %c0_i32, %arg1, %c0_i32_0 : i32, i32, i32, i32
  }
  func.func @transform_1(%arg0: i32, %arg1: i32) -> (i32, i32, i32) {
    %c0_i32 = arith.constant 0 : i32
    %c0_i32_0 = arith.constant 0 : i32
    return %arg0, %arg1, %c0_i32 : i32, i32, i32
  }
  func.func @transform_2(%arg0: i32, %arg1: i32) -> (i32, i32, i32) {
    %c0_i32 = arith.constant 0 : i32
    %c0_i32_0 = arith.constant 0 : i32
    return %arg0, %arg1, %c0_i32 : i32, i32, i32
  }
  func.func @transform_3(%arg0: i32, %arg1: i32) -> (i32, i32, i32) {
    %c0_i32 = arith.constant 0 : i32
    %c0_i32_0 = arith.constant 0 : i32
    return %arg0, %arg1, %c0_i32 : i32, i32, i32
  }
}

module attributes {stable_mosaic.version = 11 : i64} {
  func.func @_masked_sum_kernel(%arg0: i32, %arg1: i32, %arg2: memref<2xf32, #tpu.memory_space<smem>>, %arg3: memref<16x128xf32, #tpu.memory_space<vmem>>, %arg4: memref<16x128xf32, #tpu.memory_space<vmem>>, %arg5: memref<1x16x128xf32, #tpu.memory_space<vmem>>, %arg6: memref<1x16x128xf32, #tpu.memory_space<vmem>>) attributes {dimension_semantics = [#tpu.dimension_semantics<parallel>, #tpu.dimension_semantics<arbitrary>], iteration_bounds = array<i64: 1, 1>, scalar_prefetch = 0 : i64, scratch_operands = 0 : i64, tpu.core_type = #tpu.core_type<tc>, window_params = [{transform_indices = @transform_0, window_bounds = array<i64: 2>}, {transform_indices = @transform_1, window_bounds = array<i64: 16, 128>}, {transform_indices = @transform_2, window_bounds = array<i64: 16, 128>}, {transform_indices = @transform_3, window_bounds = array<i64: 1, 16, 128>}, {transform_indices = @transform_4, window_bounds = array<i64: 1, 16, 128>}]} {
    %c0_i32 = arith.constant 0 : i32
    %0 = arith.cmpi eq, %arg1, %c0_i32 : i32
    %1 = arith.extui %0 : i1 to i32
    %c0_i32_0 = arith.constant 0 : i32
    %2 = arith.cmpi ne, %1, %c0_i32_0 : i32
    scf.if %2 {
      %cst = arith.constant 0.000000e+00 : f32
      %8 = vector.broadcast %cst : f32 to vector<16x128xf32>
      %c0 = arith.constant 0 : index
      %c0_3 = arith.constant 0 : index
      %c0_4 = arith.constant 0 : index
      %9 = vector.load %arg5[%c0, %c0_3, %c0_4] : memref<1x16x128xf32, #tpu.memory_space<vmem>>, vector<1x16x128xf32>
      %10 = vector.shape_cast %9 : vector<1x16x128xf32> to vector<16x128xf32>
      %11 = vector.shape_cast %8 : vector<16x128xf32> to vector<1x16x128xf32>
      tpu.vector_store %arg5[%c0, %c0_3, %c0_4], %11 {strides = array<i32>} : memref<1x16x128xf32, #tpu.memory_space<vmem>>, vector<1x16x128xf32>,
      %cst_5 = arith.constant 0.000000e+00 : f32
      %12 = vector.broadcast %cst_5 : f32 to vector<16x128xf32>
      %c0_6 = arith.constant 0 : index
      %c0_7 = arith.constant 0 : index
      %c0_8 = arith.constant 0 : index
      %13 = vector.load %arg6[%c0_6, %c0_7, %c0_8] : memref<1x16x128xf32, #tpu.memory_space<vmem>>, vector<1x16x128xf32>
      %14 = vector.shape_cast %13 : vector<1x16x128xf32> to vector<16x128xf32>
      %15 = vector.shape_cast %12 : vector<16x128xf32> to vector<1x16x128xf32>
      tpu.vector_store %arg6[%c0_6, %c0_7, %c0_8], %15 {strides = array<i32>} : memref<1x16x128xf32, #tpu.memory_space<vmem>>, vector<1x16x128xf32>,
    } else {
    }
    %c1_i32 = arith.constant 1 : i32
    %3 = arith.muli %arg0, %c1_i32 : i32
    %4 = arith.addi %3, %arg1 : i32
    %c1_i32_1 = arith.constant 1 : i32
    %5 = arith.cmpi slt, %4, %c1_i32_1 : i32
    %6 = arith.extui %5 : i1 to i32
    %c0_i32_2 = arith.constant 0 : i32
    %7 = arith.cmpi ne, %6, %c0_i32_2 : i32
    scf.if %7 {
      %c0 = arith.constant 0 : index
      %8 = memref.load %arg2[%c0] : memref<2xf32, #tpu.memory_space<smem>>
      %c1 = arith.constant 1 : index
      %9 = memref.load %arg2[%c1] : memref<2xf32, #tpu.memory_space<smem>>
      %c0_3 = arith.constant 0 : index
      %c0_4 = arith.constant 0 : index
      %10 = vector.load %arg3[%c0_3, %c0_4] : memref<16x128xf32, #tpu.memory_space<vmem>>, vector<16x128xf32>
      %c0_5 = arith.constant 0 : index
      %c0_6 = arith.constant 0 : index
      %11 = vector.load %arg4[%c0_5, %c0_6] : memref<16x128xf32, #tpu.memory_space<vmem>>, vector<16x128xf32>
      %cst = arith.constant 0.000000e+00 : f32
      %12 = vector.broadcast %cst : f32 to vector<16x128xf32>
      %13 = arith.cmpf oge, %10, %12 : vector<16x128xf32>
      %14 = vector.broadcast %8 : f32 to vector<16x128xf32>
      %15 = arith.cmpf olt, %11, %14 : vector<16x128xf32>
      %cst_7 = arith.constant 5.000000e-01 : f32
      %16 = arith.cmpf olt, %9, %cst_7 : f32
      %17 = vector.broadcast %16 : i1 to vector<16x128xi1>
      %18 = arith.ori %15, %17 : vector<16x128xi1>
      %19 = arith.andi %13, %18 : vector<16x128xi1>
      %20 = arith.extui %19 : vector<16x128xi1> to vector<16x128xi32>
      %21 = arith.sitofp %20 : vector<16x128xi32> to vector<16x128xf32>
      %c0_8 = arith.constant 0 : index
      %c0_9 = arith.constant 0 : index
      %c0_10 = arith.constant 0 : index
      %22 = vector.load %arg5[%c0_8, %c0_9, %c0_10] : memref<1x16x128xf32, #tpu.memory_space<vmem>>, vector<1x16x128xf32>
      %23 = vector.shape_cast %22 : vector<1x16x128xf32> to vector<16x128xf32>
      %24 = arith.mulf %10, %21 : vector<16x128xf32>
      %25 = arith.addf %23, %24 : vector<16x128xf32>
      %c0_11 = arith.constant 0 : index
      %c0_12 = arith.constant 0 : index
      %c0_13 = arith.constant 0 : index
      %26 = vector.load %arg5[%c0_11, %c0_12, %c0_13] : memref<1x16x128xf32, #tpu.memory_space<vmem>>, vector<1x16x128xf32>
      %27 = vector.shape_cast %26 : vector<1x16x128xf32> to vector<16x128xf32>
      %28 = vector.shape_cast %25 : vector<16x128xf32> to vector<1x16x128xf32>
      tpu.vector_store %arg5[%c0_11, %c0_12, %c0_13], %28 {strides = array<i32>} : memref<1x16x128xf32, #tpu.memory_space<vmem>>, vector<1x16x128xf32>,
      %c0_14 = arith.constant 0 : index
      %c0_15 = arith.constant 0 : index
      %c0_16 = arith.constant 0 : index
      %29 = vector.load %arg6[%c0_14, %c0_15, %c0_16] : memref<1x16x128xf32, #tpu.memory_space<vmem>>, vector<1x16x128xf32>
      %30 = vector.shape_cast %29 : vector<1x16x128xf32> to vector<16x128xf32>
      %31 = arith.addf %30, %21 : vector<16x128xf32>
      %c0_17 = arith.constant 0 : index
      %c0_18 = arith.constant 0 : index
      %c0_19 = arith.constant 0 : index
      %32 = vector.load %arg6[%c0_17, %c0_18, %c0_19] : memref<1x16x128xf32, #tpu.memory_space<vmem>>, vector<1x16x128xf32>
      %33 = vector.shape_cast %32 : vector<1x16x128xf32> to vector<16x128xf32>
      %34 = vector.shape_cast %31 : vector<16x128xf32> to vector<1x16x128xf32>
      tpu.vector_store %arg6[%c0_17, %c0_18, %c0_19], %34 {strides = array<i32>} : memref<1x16x128xf32, #tpu.memory_space<vmem>>, vector<1x16x128xf32>,
    } else {
    }
    return
  }
  func.func @transform_0(%arg0: i32, %arg1: i32) -> i32 {
    %c0_i32 = arith.constant 0 : i32
    %c0_i32_0 = arith.constant 0 : i32
    return %c0_i32 : i32
  }
  func.func @transform_1(%arg0: i32, %arg1: i32) -> (i32, i32) {
    %c1_i32 = arith.constant 1 : i32
    %0 = arith.muli %arg0, %c1_i32 : i32
    %1 = arith.addi %0, %arg1 : i32
    %c0_i32 = arith.constant 0 : i32
    %2 = arith.minsi %1, %c0_i32 : i32
    %c0_i32_0 = arith.constant 0 : i32
    %c0_i32_1 = arith.constant 0 : i32
    return %2, %c0_i32_0 : i32, i32
  }
  func.func @transform_2(%arg0: i32, %arg1: i32) -> (i32, i32) {
    %c1_i32 = arith.constant 1 : i32
    %0 = arith.muli %arg0, %c1_i32 : i32
    %1 = arith.addi %0, %arg1 : i32
    %c0_i32 = arith.constant 0 : i32
    %2 = arith.minsi %1, %c0_i32 : i32
    %c0_i32_0 = arith.constant 0 : i32
    %c0_i32_1 = arith.constant 0 : i32
    return %2, %c0_i32_0 : i32, i32
  }
  func.func @transform_3(%arg0: i32, %arg1: i32) -> (i32, i32, i32) {
    %c0_i32 = arith.constant 0 : i32
    %c0_i32_0 = arith.constant 0 : i32
    %c0_i32_1 = arith.constant 0 : i32
    return %arg0, %c0_i32, %c0_i32_0 : i32, i32, i32
  }
  func.func @transform_4(%arg0: i32, %arg1: i32) -> (i32, i32, i32) {
    %c0_i32 = arith.constant 0 : i32
    %c0_i32_0 = arith.constant 0 : i32
    %c0_i32_1 = arith.constant 0 : i32
    return %arg0, %c0_i32, %c0_i32_0 : i32, i32, i32
  }
}

</mosaic_0001>

<bundles_post_ra>
// kernel: ohem_cross_entropy_loss.2
= control target key start
LH: loop header
LB: loop body
LE: loop exit
PB: predicated region body
PF: predicated region fallthrough
CT: control target
= control target key end

     0   :  { %s525_s12 = smov 0   ;;  %s527_s13 = smov 0   ;;  %s569_s0 = inlined_call_operand.vmem [shape: f32[2,4,8,128], index: 0, kind: input, shape index: {}]   ;;  %s570_s1 = inlined_call_operand.vmem [shape: s32[2,8,128], index: 1, kind: input, shape index: {}]   ;;  %s571_s2 = inlined_call_operand.vmem [shape: f32[2,8,128], index: 2, kind: output, shape index: {0}]   ;;  %s572_s3 = inlined_call_operand.vmem [shape: f32[2,8,128], index: 3, kind: output, shape index: {1}]  }
   0x1   :  { %s529_s14 = smov 0  }
   0x2 LB: > { %s26_s15 = sadd.s32 1, %s499_s13  ;;  %p436_p0 = scmp.ge.s32.totalorder %s503_s14, 1  ;;  %s503_s14 = sphi %s529_s14, %s14_s14   ;;  %s499_s13 = sphi %s527_s13, %s574_s13   ;;  %s495_s12 = sphi %s525_s12, %s573_s12  }
   0x3   : > { %p28_p1 = scmp.ge.s32.totalorder %s26_s15, 2  ;;  %p175_p2 = scmp.lt.s32.totalorder %s503_s14, 3 }
   0x5   : > { %s576_s15 = smov (%p28_p1, %s26_s15), 0  ;;  %p176_p3 = pnand %p436_p0, %p175_p2 }
   0x6   : > { %p218_p4 = scmp.lt.s32.totalorder (!%p176_p3), %s495_s12, 1 }
   0x7   : > { %179 = sbr.rel (%p176_p3) target bundleno = 68 (0x44), region = 28 }
   0xc   : > { %s578_s12 = smov (!%p218_p4, %s495_s12), 1 }
   0xd   : > { %s444_s16 = sshll.u32 %s578_s12, 5  ;;  %s546_s20 = sshll.u32 %s578_s12, 3 }
   0xe   : > { %s225_s19 = scalar_lea.vmem %s569_s0, %s444_s16  ;;  %s232_s23 = scalar_lea.vmem %s570_s1, %s546_s20 }
   0xf   : > { %v247_v0 = vld [vmem:[%s225_s19] sm:$0xff]  ;;  %v248_v1 = vld [vmem:[%s225_s19 + $0x8] sm:$0xff]  ;;  %v249_v2 = vld [vmem:[%s225_s19 + $0x10] sm:$0xff]  ;;  %s239_s26 = scalar_lea.vmem %s571_s2, %s546_s20  ;;  %s246_s29 = scalar_lea.vmem %s572_s3, %s546_s20 }
  0x10   : > { %v250_v3 = vld [vmem:[%s225_s19 + $0x18] sm:$0xff]  ;;  %v252_v4 = vmax.f32 %v247_v0, %v248_v1  ;;  %v251_v18 = vld [vmem:[%s232_s23] sm:$0xff] }
  0x11   : > { %v253_v5 = vmax.f32 %v249_v2, %v250_v3  ;;  %vm270_vm0 = vcmp.eq.s32.totalorder %v251_v18, 0  ;;  %vm271_vm1 = vcmp.eq.s32.totalorder %v251_v18, 1  ;;  %vm272_vm2 = vcmp.eq.s32.totalorder %v251_v18, 2 }
  0x12   : > { %v274_v25 = vsel %vm270_vm0, %v247_v0, 0.0  ;;  %v275_v26 = vsel %vm271_vm1, %v248_v1, 0.0  ;;  %vm273_vm3 = vcmp.eq.s32.totalorder %v251_v18, 3  ;;  %v276_v30 = vsel %vm272_vm2, %v249_v2, 0.0 }
  0x13   : > { %v254_v6 = vmax.f32 %v252_v4, %v253_v5  ;;  %v278_v29 = vadd.f32 %v275_v26, %v274_v25  ;;  %v277_v34 = vsel %vm273_vm3, %v250_v3, 0.0  ;;  %vm294_vm4 = vcmp.ne.s32.totalorder %v251_v18, 3 }
  0x15   : > { %v255_v7 = vsub.f32 %v247_v0, %v254_v6  ;;  %v256_v8 = vsub.f32 %v248_v1, %v254_v6  ;;  %v257_v9 = vsub.f32 %v249_v2, %v254_v6  ;;  %v258_v10 = vsub.f32 %v250_v3, %v254_v6 }
  0x16   : > { %v279_v33 = vadd.f32 %v278_v29, %v276_v30 }
  0x17   : > { %v259_v11 = vmul.f32 1.442695, %v255_v7  ;;  %v261_v12 = vmul.f32 1.442695, %v256_v8  ;;  %v263_v13 = vmul.f32 1.442695, %v257_v9 }
  0x18   : > { %v265_v14 = vmul.f32 1.442695, %v258_v10  ;;  %v280_v38 = vadd.f32 %v279_v33, %v277_v34 }
  0x19   : > { %469 = vpow2.f32 %v259_v11 }
  0x1a   : > { %471 = vpow2.f32 %v261_v12 }
  0x1b   : > { %473 = vpow2.f32 %v263_v13 }
  0x1c   : > { %475 = vpow2.f32 %v265_v14 }
  0x26   : > { %v470_v15 = vpop.eup %469 }
  0x27   : > { %v472_v16 = vpop.eup %471  ;;  %v281_v23 = vsel %vm270_vm0, %v470_v15, 0.0 }
  0x28   : > { %v474_v17 = vpop.eup %473  ;;  %v267_v19 = vadd.f32 %v472_v16, %v470_v15  ;;  %v282_v24 = vsel %vm271_vm1, %v472_v16, 0.0 }
  0x29   : > { %v476_v20 = vpop.eup %475  ;;  %v285_v27 = vadd.f32 %v282_v24, %v281_v23  ;;  %v283_v28 = vsel %vm272_vm2, %v474_v17, 0.0 }
  0x2a   : > { %v268_v21 = vadd.f32 %v474_v17, %v267_v19  ;;  %v284_v32 = vsel %vm273_vm3, %v476_v20, 0.0 }
  0x2b   : > { %v286_v31 = vadd.f32 %v285_v27, %v283_v28 }
  0x2c   : > { %v269_v22 = vadd.f32 %v476_v20, %v268_v21 }
  0x2d   : > { %v287_v35 = vadd.f32 %v286_v31, %v284_v32 }
  0x2e   : > { %477 = vlog2.f32 %v269_v22 }
  0x2f   : > { %479 = vrcp.f32 %v269_v22 }
  0x3b   : > { %v478_v36 = vpop.eup %477 }
  0x3c   : > { %v480_v37 = vpop.eup %479  ;;  %v289_v39 = vmul.f32 0.6931472, %v478_v36 }
  0x3d   : > { %v293_v40 = vmul.f32 %v480_v37, %v287_v35 }
  0x3e   : > { %v290_v41 = vadd.f32 %v289_v39, %v254_v6 }
  0x3f   : > { %v297_v42 = vsel %vm294_vm4, %v293_v40, 2.0 }
  0x40   : > { %v291_v43 = vsub.f32 %v290_v41, %v280_v38  ;;  %298 = vst [vmem:[%s239_s26] sm:$0xff] %v297_v42 }
  0x42   : > { %v295_v44 = vsel %vm294_vm4, %v291_v43, -1.0 }
  0x43   : > { %296 = vst [vmem:[%s246_s29] sm:$0xff] %v295_v44 }
  0x44 PF: > { %s14_s14 = sadd.s32 1, %s503_s14   ;;  %s573_s12 = smov %s499_s13 }
  0x45   : > { %p11_p5 = scmp.ge.s32.totalorder %s14_s14, 4   ;;  %s574_s13 = smov %s576_s15 }
  0x47   :  { %13 = sbr.rel (!%p11_p5) target bundleno = 2 (0x2), region = 73 }

// kernel: ohem_cross_entropy_loss.3
= control target key start
LH: loop header
LB: loop body
LE: loop exit
PB: predicated region body
PF: predicated region fallthrough
CT: control target
= control target key end

     0   :  { %10 = vsyncpa [#allocation3], 0  ;;  %s237_s0 = inlined_call_operand.vmem [shape: f32[2], index: 0, kind: input, shape index: {}]   ;;  %s238_s1 = inlined_call_operand.vmem [shape: f32[16,128], index: 1, kind: input, shape index: {}]   ;;  %s239_s2 = inlined_call_operand.vmem [shape: f32[16,128], index: 2, kind: input, shape index: {}]   ;;  %s240_s3 = inlined_call_operand.vmem [shape: f32[1,16,128], index: 3, kind: output, shape index: {0}]   ;;  %s241_s4 = inlined_call_operand.vmem [shape: f32[1,16,128], index: 4, kind: output, shape index: {1}]  }
   0x1   :  { %s17_s17 = sshll.u32 %s237_s0, 4  ;;  %s18_s17 = int_to_ptr.vmem [resolvable:$true] %s17_s17 }
   0x2   :  { %s169_s18 = scalar_lea.vmem %s18_s17, 16  ;;  %p174_p1 = scmp.lt.s32.totalorder %s18_s17, %s18_s17 }
   0x3   :  { %p170_p0 = scmp.ne.s32.totalorder %s18_s17, %s169_s18  ;;  %p175_p2 = scmp.lt.s32.totalorder %s169_s18, %s169_s18 }
   0x5   :  { %p176_p3 = por %p175_p2, %p174_p1 }
   0x7   :  { %p177_p4 = pnand %p176_p3, %p170_p0 }
   0x9   :  { %180 = shalt.err (!%p177_p4)
}
   0xa   :  { %s183_s19 = smov [#allocation2]  }
   0xb   :  { %20 = dma.vmem_to_smem %s18_s17, 16, %s183_s19, [#allocation3]  }
   0xc   :  { %181 = dma.done.wait [#allocation3], 16  }
   0xd   :  { %182 = vsyncadd [#allocation3], 4294967280 }
   0xe   :  { %52 = sfence }
   0xf   :  { %s106_s20 = sld [smem:[#allocation2]]  ;;  %v110_v0 = vld [vmem:[%s239_s2] sm:$0xff]  ;;  %v111_v3 = vld [vmem:[%s239_s2 + $0x8] sm:$0xff]  ;;  %v184_v6 = vmov 0.0  }
  0x10   :  { %s164_s21 = sld [smem:[#allocation2 + $0x1]]  ;;  %v108_v2 = vld [vmem:[%s238_s1] sm:$0xff]  ;;  %v109_v4 = vld [vmem:[%s238_s1 + $0x8] sm:$0xff] }
  0x11   :  { %vm112_vm1 = vcmp.ge.f32.partialorder %v108_v2, 0.0  ;;  %vm113_vm5 = vcmp.ge.f32.partialorder %v109_v4, 0.0 }
  0x15   :  { %v114_v1 = vstv %s106_s20 }
  0x16   :  { %p117_p5 = scmp.lt.f32.partialorder %s164_s21, 0.5  ;;  %vm115_vm0 = vcmp.lt.f32.partialorder %v110_v0, %v114_v1  ;;  %vm116_vm3 = vcmp.lt.f32.partialorder %v111_v3, %v114_v1 }
  0x18   :  { %s118_s25 = scalar_select %p117_p5, 1, 0 }
  0x1a   :  { %v119_v5 = vstv %s118_s25 }
  0x1b   :  { %vm120_vm2 = vcmp.eq.s32.totalorder %v119_v5, 1 }
  0x1c   :  { %vm121_vm4 = vmor %vm115_vm0, %vm120_vm2 }
  0x1d   :  { %vm123_vm6 = vmand %vm112_vm1, %vm121_vm4 }
  0x1e   :  { %v165_v7 = vsel %vm123_vm6, 1.0, %v184_v6  ;;  %vm122_vm7 = vmor %vm116_vm3, %vm120_vm2 }
  0x1f   :  { %v131_v8 = vmul.f32 %v165_v7, %v108_v2  ;;  %vm124_vm8 = vmand %vm113_vm5, %vm122_vm7  ;;  %141 = vst [vmem:[%s241_s4] sm:$0xff] %v165_v7 }
  0x20   :  { %v166_v9 = vsel %vm124_vm8, 1.0, %v184_v6 }
  0x21   :  { %v132_v10 = vmul.f32 %v166_v9, %v109_v4  ;;  %135 = vst [vmem:[%s240_s3] sm:$0xff] %v131_v8  ;;  %142 = vst [vmem:[%s241_s4 + $0x8] sm:$0xff] %v166_v9 }
  0x23   :  { %136 = vst [vmem:[%s240_s3 + $0x8] sm:$0xff] %v132_v10 }
  0x24   :  { %151 = vsyncpa [#allocation3], 1 }

</bundles_post_ra>
